<compile_context>
chip_gen: v6e
topology: v6e:2x2x1
jax: 0.10.0
libtpu: 0.0.40
codegen_flags: <defaults>
</compile_context>

<pallas_src>
import functools

import jax
import jax.numpy as jnp
from jax.experimental import pallas as pl
from jax.experimental.pallas import tpu as pltpu

OUT_LANES = 128  # lane-dense output slab width


def _round_up(x, m):
    return ((x + m - 1) // m) * m


def _mlp_kernel(goal_ref, m1_ref, m2_ref,
                w1g_ref, w1m1_ref, w1m2_ref, b1_ref,
                w2_ref, b2_ref, w3_ref, b3_ref, o_ref):
    tb = o_ref.shape[0]
    gsize = w1g_ref.shape[0]

    # Build the goal one-hot in-register (no HBM x materialization).
    goal = goal_ref[...]                                            # (tb, 1) int32
    lane_ids = jax.lax.broadcasted_iota(jnp.int32, (tb, gsize), 1)  # (tb, gsize)
    onehot = (goal == lane_ids).astype(w1g_ref.dtype)

    # Layer 1: three bf16 MXU dots into a single f32 accumulator.
    h1 = jnp.dot(onehot, w1g_ref[...], preferred_element_type=jnp.float32)
    h1 = h1 + jnp.dot(m1_ref[...], w1m1_ref[...], preferred_element_type=jnp.float32)
    h1 = h1 + jnp.dot(m2_ref[...], w1m2_ref[...], preferred_element_type=jnp.float32)
    h1 = jnp.maximum(h1 + b1_ref[...], 0.0)                         # f32 bias + ReLU

    # Layer 2: bf16 operands for the MXU, f32 accumulate, f32 bias/ReLU.
    h2 = jnp.dot(h1.astype(w2_ref.dtype), w2_ref[...],
                 preferred_element_type=jnp.float32)
    h2 = jnp.maximum(h2 + b2_ref[...], 0.0)

    # Layer 3: lane-padded (H, 128) weight -> full-lane, unmasked store.
    out = jnp.dot(h2.astype(w3_ref.dtype), w3_ref[...],
                  preferred_element_type=jnp.float32)
    o_ref[...] = out + b3_ref[...]


def _mlp_pallas(goal2d, m1, m2, w1g, w1m1, w1m2, b1, w2, b2, w3p, b3p, *, tb):
    bp = goal2d.shape[0]
    msize = m1.shape[1]
    grid = (bp // tb,)

    def full(a):
        return pl.BlockSpec(a.shape, lambda i: (0, 0))  # VMEM-resident weights

    return pl.pallas_call(
        _mlp_kernel,
        out_shape=jax.ShapeDtypeStruct((bp, OUT_LANES), jnp.float32),
        grid=grid,
        in_specs=[
            pl.BlockSpec((tb, 1), lambda i: (i, 0)),        # goal ids
            pl.BlockSpec((tb, msize), lambda i: (i, 0)),    # monster1 (bf16)
            pl.BlockSpec((tb, msize), lambda i: (i, 0)),    # monster2 (bf16)
            full(w1g), full(w1m1), full(w1m2), full(b1),
            full(w2), full(b2), full(w3p), full(b3p),
        ],
        out_specs=pl.BlockSpec((tb, OUT_LANES), lambda i: (i, 0)),
        compiler_params=pltpu.CompilerParams(
            dimension_semantics=("parallel",)),
    )(goal2d, m1, m2, w1g, w1m1, w1m2, b1, w2, b2, w3p, b3p)


def init_lmq_params(key, monster_size, goal_size, hidden_size=32, out_size=2):
    """Deterministic init matching nn.Linear's U(-1/sqrt(fan_in), 1/sqrt(fan_in))."""
    d_in = goal_size + 2 * monster_size
    dims = [(d_in, hidden_size), (hidden_size, hidden_size), (hidden_size, out_size)]
    params = {}
    for i, (fi, fo) in enumerate(dims, start=1):
        key, kw, kb = jax.random.split(key, 3)
        bound = 1.0 / (fi ** 0.5)
        params[f"w{i}"] = jax.random.uniform(kw, (fi, fo), jnp.float32, -bound, bound)
        params[f"b{i}"] = jax.random.uniform(kb, (1, fo), jnp.float32, -bound, bound)
    return params


@functools.partial(jax.jit, static_argnames="goal_size")
def lmq_forward(goal_ids, monster1, monster2, params, goal_size):
    """goal_ids: int [B]; monster1/monster2: float [B, monster_size] embeddings."""
    B = goal_ids.shape[0]
    M = monster1.shape[1]
    H = params["w2"].shape[0]
    out_size = params["w3"].shape[1]

    # One-time weight prep: bf16 cast, split w1 into goal/monster column blocks,
    # lane-pad the output projection to 128 columns.
    w1 = params["w1"].astype(jnp.bfloat16)
    w1g = w1[:goal_size]
    w1m1 = w1[goal_size:goal_size + M]
    w1m2 = w1[goal_size + M:]
    w2 = params["w2"].astype(jnp.bfloat16)
    w3p = jnp.zeros((H, OUT_LANES), jnp.bfloat16)
    w3p = w3p.at[:, :out_size].set(params["w3"].astype(jnp.bfloat16))
    b1 = params["b1"].astype(jnp.float32)
    b2 = params["b2"].astype(jnp.float32)
    b3p = jnp.zeros((1, OUT_LANES), jnp.float32)
    b3p = b3p.at[:, :out_size].set(params["b3"].astype(jnp.float32))

    # Batch tiling: ~512-row tiles when B is large (HBM-roofline sweet spot),
    # otherwise a single sublane-aligned tile.  Weights + a double-buffered
    # bf16 512-row tile are well under VMEM limits on v5e/v6e/v7x.
    tb = 512 if B >= 512 else _round_up(B, 8)
    bp = _round_up(B, tb)
    pad = bp - B

    goal2d = goal_ids.astype(jnp.int32).reshape(B, 1)
    m1 = monster1.astype(jnp.bfloat16)
    m2 = monster2.astype(jnp.bfloat16)
    if pad:
        goal2d = jnp.pad(goal2d, ((0, pad), (0, 0)))
        m1 = jnp.pad(m1, ((0, pad), (0, 0)))
        m2 = jnp.pad(m2, ((0, pad), (0, 0)))

    out = _mlp_pallas(goal2d, m1, m2, w1g, w1m1, w1m2, b1, w2, b2, w3p, b3p, tb=tb)
    return out[:B, :out_size]


def _ref_forward(goal_ids, monster1, monster2, params, goal_size):
    """Pure-JAX reference with the same bf16 rounding as the kernel."""
    bf = lambda a: a.astype(jnp.bfloat16).astype(jnp.float32)
    x = jnp.concatenate(
        [jax.nn.one_hot(goal_ids, goal_size, dtype=jnp.float32),
         bf(monster1), bf(monster2)], axis=-1)
    h = jnp.maximum(x @ bf(params["w1"]) + params["b1"], 0.0)
    h = jnp.maximum(bf(h) @ bf(params["w2"]) + params["b2"], 0.0)
    return bf(h) @ bf(params["w3"]) + params["b3"]


if __name__ == "__main__":
    goal_size = 16
    monster_size = 512   # t5-small hidden size (embeddings assumed precomputed)
    batch = 16

    key = jax.random.PRNGKey(0)
    kp, kg, km1, km2 = jax.random.split(key, 4)

    params = init_lmq_params(kp, monster_size, goal_size)
    goal = jax.random.randint(kg, (batch,), 0, goal_size)
    monster1 = jax.random.normal(km1, (batch, monster_size), jnp.float32)
    monster2 = jax.random.normal(km2, (batch, monster_size), jnp.float32)

    out = jax.block_until_ready(lmq_forward(goal, monster1, monster2, params, goal_size))

    ref = _ref_forward(goal, monster1, monster2, params, goal_size)
    assert out.shape == (batch, 2), out.shape
    assert jnp.allclose(out, ref, atol=1e-2, rtol=1e-2), "mismatch vs reference"

    print("KERNEL_OK")
</pallas_src>

<mosaic_0001>
module attributes {stable_mosaic.version = 11 : i64} {
  func.func @_mlp_kernel(%arg0: i32, %arg1: memref<16x1xi32, #tpu.memory_space<vmem>>, %arg2: memref<16x512xbf16, #tpu.memory_space<vmem>>, %arg3: memref<16x512xbf16, #tpu.memory_space<vmem>>, %arg4: memref<16x32xbf16, #tpu.memory_space<vmem>>, %arg5: memref<512x32xbf16, #tpu.memory_space<vmem>>, %arg6: memref<512x32xbf16, #tpu.memory_space<vmem>>, %arg7: memref<1x32xf32, #tpu.memory_space<vmem>>, %arg8: memref<32x32xbf16, #tpu.memory_space<vmem>>, %arg9: memref<1x32xf32, #tpu.memory_space<vmem>>, %arg10: memref<32x128xbf16, #tpu.memory_space<vmem>>, %arg11: memref<1x128xf32, #tpu.memory_space<vmem>>, %arg12: memref<16x128xf32, #tpu.memory_space<vmem>>) attributes {dimension_semantics = [#tpu.dimension_semantics<parallel>], iteration_bounds = array<i64: 1>, scalar_prefetch = 0 : i64, scratch_operands = 0 : i64, tpu.core_type = #tpu.core_type<tc>, window_params = [{transform_indices = @transform_0, window_bounds = array<i64: 16, 1>}, {transform_indices = @transform_1, window_bounds = array<i64: 16, 512>}, {transform_indices = @transform_2, window_bounds = array<i64: 16, 512>}, {pipeline_mode = #tpu.pipeline_mode<synchronous>, transform_indices = @transform_3, window_bounds = array<i64: 16, 32>}, {pipeline_mode = #tpu.pipeline_mode<synchronous>, transform_indices = @transform_4, window_bounds = array<i64: 512, 32>}, {pipeline_mode = #tpu.pipeline_mode<synchronous>, transform_indices = @transform_5, window_bounds = array<i64: 512, 32>}, {pipeline_mode = #tpu.pipeline_mode<synchronous>, transform_indices = @transform_6, window_bounds = array<i64: 1, 32>}, {pipeline_mode = #tpu.pipeline_mode<synchronous>, transform_indices = @transform_7, window_bounds = array<i64: 32, 32>}, {pipeline_mode = #tpu.pipeline_mode<synchronous>, transform_indices = @transform_8, window_bounds = array<i64: 1, 32>}, {pipeline_mode = #tpu.pipeline_mode<synchronous>, transform_indices = @transform_9, window_bounds = array<i64: 32, 128>}, {pipeline_mode = #tpu.pipeline_mode<synchronous>, transform_indices = @transform_10, window_bounds = array<i64: 1, 128>}, {transform_indices = @transform_11, window_bounds = array<i64: 16, 128>}]} {
    %c0 = arith.constant 0 : index
    %c0_0 = arith.constant 0 : index
    %0 = vector.load %arg1[%c0, %c0_0] : memref<16x1xi32, #tpu.memory_space<vmem>>, vector<16x1xi32>
    %1 = tpu.iota {dimensions = array<i32: 1>} : vector<16x16xi32>
    %2 = vector.broadcast %0 : vector<16x1xi32> to vector<16x16xi32>
    %3 = arith.cmpi eq, %2, %1 : vector<16x16xi32>
    %4 = arith.extui %3 : vector<16x16xi1> to vector<16x16xi32>
    %5 = arith.sitofp %4 : vector<16x16xi32> to vector<16x16xf32>
    %6 = arith.truncf %5 : vector<16x16xf32> to vector<16x16xbf16>
    %c0_1 = arith.constant 0 : index
    %c0_2 = arith.constant 0 : index
    %7 = vector.load %arg4[%c0_1, %c0_2] : memref<16x32xbf16, #tpu.memory_space<vmem>>, vector<16x32xbf16>
    %cst = arith.constant dense<0.000000e+00> : vector<16x32xf32>
    %8 = tpu.matmul %6, %7, %cst {dimension_numbers = #tpu.dot_dimension_numbers<[1], [0], [0], [1], [0, 0, 1, 1], [], []>} : vector<16x16xbf16>, vector<16x32xbf16>, vector<16x32xf32> -> vector<16x32xf32>
    %c0_3 = arith.constant 0 : index
    %c0_4 = arith.constant 0 : index
    %9 = vector.load %arg2[%c0_3, %c0_4] : memref<16x512xbf16, #tpu.memory_space<vmem>>, vector<16x512xbf16>
    %c0_5 = arith.constant 0 : index
    %c0_6 = arith.constant 0 : index
    %10 = vector.load %arg5[%c0_5, %c0_6] : memref<512x32xbf16, #tpu.memory_space<vmem>>, vector<512x32xbf16>
    %cst_7 = arith.constant dense<0.000000e+00> : vector<16x32xf32>
    %11 = tpu.matmul %9, %10, %cst_7 {dimension_numbers = #tpu.dot_dimension_numbers<[1], [0], [0], [1], [0, 0, 1, 1], [], []>} : vector<16x512xbf16>, vector<512x32xbf16>, vector<16x32xf32> -> vector<16x32xf32>
    %12 = arith.addf %8, %11 : vector<16x32xf32>
    %c0_8 = arith.constant 0 : index
    %c0_9 = arith.constant 0 : index
    %13 = vector.load %arg3[%c0_8, %c0_9] : memref<16x512xbf16, #tpu.memory_space<vmem>>, vector<16x512xbf16>
    %c0_10 = arith.constant 0 : index
    %c0_11 = arith.constant 0 : index
    %14 = vector.load %arg6[%c0_10, %c0_11] : memref<512x32xbf16, #tpu.memory_space<vmem>>, vector<512x32xbf16>
    %cst_12 = arith.constant dense<0.000000e+00> : vector<16x32xf32>
    %15 = tpu.matmul %13, %14, %cst_12 {dimension_numbers = #tpu.dot_dimension_numbers<[1], [0], [0], [1], [0, 0, 1, 1], [], []>} : vector<16x512xbf16>, vector<512x32xbf16>, vector<16x32xf32> -> vector<16x32xf32>
    %16 = arith.addf %12, %15 : vector<16x32xf32>
    %c0_13 = arith.constant 0 : index
    %c0_14 = arith.constant 0 : index
    %17 = vector.load %arg7[%c0_13, %c0_14] : memref<1x32xf32, #tpu.memory_space<vmem>>, vector<1x32xf32>
    %18 = vector.broadcast %17 : vector<1x32xf32> to vector<16x32xf32>
    %19 = arith.addf %16, %18 : vector<16x32xf32>
    %cst_15 = arith.constant 0.000000e+00 : f32
    %20 = vector.broadcast %cst_15 : f32 to vector<16x32xf32>
    %21 = arith.maximumf %19, %20 : vector<16x32xf32>
    %22 = arith.truncf %21 : vector<16x32xf32> to vector<16x32xbf16>
    %c0_16 = arith.constant 0 : index
    %c0_17 = arith.constant 0 : index
    %23 = vector.load %arg8[%c0_16, %c0_17] : memref<32x32xbf16, #tpu.memory_space<vmem>>, vector<32x32xbf16>
    %cst_18 = arith.constant dense<0.000000e+00> : vector<16x32xf32>
    %24 = tpu.matmul %22, %23, %cst_18 {dimension_numbers = #tpu.dot_dimension_numbers<[1], [0], [0], [1], [0, 0, 1, 1], [], []>} : vector<16x32xbf16>, vector<32x32xbf16>, vector<16x32xf32> -> vector<16x32xf32>
    %c0_19 = arith.constant 0 : index
    %c0_20 = arith.constant 0 : index
    %25 = vector.load %arg9[%c0_19, %c0_20] : memref<1x32xf32, #tpu.memory_space<vmem>>, vector<1x32xf32>
    %26 = vector.broadcast %25 : vector<1x32xf32> to vector<16x32xf32>
    %27 = arith.addf %24, %26 : vector<16x32xf32>
    %cst_21 = arith.constant 0.000000e+00 : f32
    %28 = vector.broadcast %cst_21 : f32 to vector<16x32xf32>
    %29 = arith.maximumf %27, %28 : vector<16x32xf32>
    %30 = arith.truncf %29 : vector<16x32xf32> to vector<16x32xbf16>
    %c0_22 = arith.constant 0 : index
    %c0_23 = arith.constant 0 : index
    %31 = vector.load %arg10[%c0_22, %c0_23] : memref<32x128xbf16, #tpu.memory_space<vmem>>, vector<32x128xbf16>
    %cst_24 = arith.constant dense<0.000000e+00> : vector<16x128xf32>
    %32 = tpu.matmul %30, %31, %cst_24 {dimension_numbers = #tpu.dot_dimension_numbers<[1], [0], [0], [1], [0, 0, 1, 1], [], []>} : vector<16x32xbf16>, vector<32x128xbf16>, vector<16x128xf32> -> vector<16x128xf32>
    %c0_25 = arith.constant 0 : index
    %c0_26 = arith.constant 0 : index
    %33 = vector.load %arg11[%c0_25, %c0_26] : memref<1x128xf32, #tpu.memory_space<vmem>>, vector<1x128xf32>
    %34 = vector.broadcast %33 : vector<1x128xf32> to vector<16x128xf32>
    %35 = arith.addf %32, %34 : vector<16x128xf32>
    %c0_27 = arith.constant 0 : index
    %c0_28 = arith.constant 0 : index
    %36 = vector.load %arg12[%c0_27, %c0_28] : memref<16x128xf32, #tpu.memory_space<vmem>>, vector<16x128xf32>
    tpu.vector_store %arg12[%c0_27, %c0_28], %35 {strides = array<i32>} : memref<16x128xf32, #tpu.memory_space<vmem>>, vector<16x128xf32>,
    return
  }
  func.func @transform_0(%arg0: i32) -> (i32, i32) {
    %c0_i32 = arith.constant 0 : i32
    %c0_i32_0 = arith.constant 0 : i32
    return %arg0, %c0_i32 : i32, i32
  }
  func.func @transform_1(%arg0: i32) -> (i32, i32) {
    %c0_i32 = arith.constant 0 : i32
    %c0_i32_0 = arith.constant 0 : i32
    return %arg0, %c0_i32 : i32, i32
  }
  func.func @transform_2(%arg0: i32) -> (i32, i32) {
    %c0_i32 = arith.constant 0 : i32
    %c0_i32_0 = arith.constant 0 : i32
    return %arg0, %c0_i32 : i32, i32
  }
  func.func @transform_3(%arg0: i32) -> (i32, i32) {
    %c0_i32 = arith.constant 0 : i32
    %c0_i32_0 = arith.constant 0 : i32
    %c0_i32_1 = arith.constant 0 : i32
    return %c0_i32, %c0_i32_0 : i32, i32
  }
  func.func @transform_4(%arg0: i32) -> (i32, i32) {
    %c0_i32 = arith.constant 0 : i32
    %c0_i32_0 = arith.constant 0 : i32
    %c0_i32_1 = arith.constant 0 : i32
    return %c0_i32, %c0_i32_0 : i32, i32
  }
  func.func @transform_5(%arg0: i32) -> (i32, i32) {
    %c0_i32 = arith.constant 0 : i32
    %c0_i32_0 = arith.constant 0 : i32
    %c0_i32_1 = arith.constant 0 : i32
    return %c0_i32, %c0_i32_0 : i32, i32
  }
  func.func @transform_6(%arg0: i32) -> (i32, i32) {
    %c0_i32 = arith.constant 0 : i32
    %c0_i32_0 = arith.constant 0 : i32
    %c0_i32_1 = arith.constant 0 : i32
    return %c0_i32, %c0_i32_0 : i32, i32
  }
  func.func @transform_7(%arg0: i32) -> (i32, i32) {
    %c0_i32 = arith.constant 0 : i32
    %c0_i32_0 = arith.constant 0 : i32
    %c0_i32_1 = arith.constant 0 : i32
    return %c0_i32, %c0_i32_0 : i32, i32
  }
  func.func @transform_8(%arg0: i32) -> (i32, i32) {
    %c0_i32 = arith.constant 0 : i32
    %c0_i32_0 = arith.constant 0 : i32
    %c0_i32_1 = arith.constant 0 : i32
    return %c0_i32, %c0_i32_0 : i32, i32
  }
  func.func @transform_9(%arg0: i32) -> (i32, i32) {
    %c0_i32 = arith.constant 0 : i32
    %c0_i32_0 = arith.constant 0 : i32
    %c0_i32_1 = arith.constant 0 : i32
    return %c0_i32, %c0_i32_0 : i32, i32
  }
  func.func @transform_10(%arg0: i32) -> (i32, i32) {
    %c0_i32 = arith.constant 0 : i32
    %c0_i32_0 = arith.constant 0 : i32
    %c0_i32_1 = arith.constant 0 : i32
    return %c0_i32, %c0_i32_0 : i32, i32
  }
  func.func @transform_11(%arg0: i32) -> (i32, i32) {
    %c0_i32 = arith.constant 0 : i32
    %c0_i32_0 = arith.constant 0 : i32
    return %arg0, %c0_i32 : i32, i32
  }
}

</mosaic_0001>

<bundles_post_ra>
// kernel: lmq_forward.1
= control target key start
LH: loop header
LB: loop body
LE: loop exit
PB: predicated region body
PF: predicated region fallthrough
CT: control target
= control target key end

     0   :  { %v1279_v0 = vmov 0   ;;  %v1280_v38 = vmov 0.0   ;;  %vm1281_vm0 = vmmov 0   ;;  %v41_v60 = vlaneseq  ;;  %s1609_s0 = inlined_call_operand.vmem [shape: s32[16,1], index: 0, kind: input, shape index: {}]   ;;  %s1610_s4 = inlined_call_operand.vmem [shape: bf16[512,32], index: 4, kind: input, shape index: {}]   ;;  %s1611_s1 = inlined_call_operand.vmem [shape: bf16[16,512], index: 1, kind: input, shape index: {}]   ;;  %s1612_s3 = inlined_call_operand.vmem [shape: bf16[16,32], index: 3, kind: input, shape index: {}]   ;;  %s1613_s5 = inlined_call_operand.vmem [shape: bf16[512,32], index: 5, kind: input, shape index: {}]   ;;  %s1614_s2 = inlined_call_operand.vmem [shape: bf16[16,512], index: 2, kind: input, shape index: {}]   ;;  %s1615_s7 = inlined_call_operand.vmem [shape: bf16[32,32], index: 7, kind: input, shape index: {}]   ;;  %s1616_s6 = inlined_call_operand.vmem [shape: f32[1,32], index: 6, kind: input, shape index: {}]   ;;  %s1617_s9 = inlined_call_operand.vmem [shape: bf16[32,128], index: 9, kind: input, shape index: {}]   ;;  %s1618_s8 = inlined_call_operand.vmem [shape: f32[1,32], index: 8, kind: input, shape index: {}]   ;;  %s1619_s10 = inlined_call_operand.vmem [shape: f32[1,128], index: 10, kind: input, shape index: {}]   ;;  %s1620_s11 = inlined_call_operand.vmem [shape: f32[16,128], index: 11, kind: output, shape index: {}]  }
   0x1   :  { %1197 = vset.pattern.permute.xlu0 %v1279_v0  ;;  %v39_v1 = vld [vmem:[%s1609_s0] sm:$0xff]  ;;  %v40_v2 = vld [vmem:[%s1609_s0 + $0x8] sm:$0xff]  ;;  %v1198_v3 = vld [vmem:[%s1610_s4 + $0x78] sm:$0xff]   ;;  %vm426_vm3 = vcmask 130048   ;;  %vm870_vm4 = vcmask 261120  }
   0x2   :  { %44 = vperm.xlu0 %1197, %v39_v1   ;;  %v1199_v4 = vld [vmem:[%s1610_s4 + $0xf8] sm:$0xff]   ;;  %1076 = vmatprep.subr.bf16.mxu0 %v1198_v3  ;;  %v1202_v7 = vld [vmem:[%s1610_s4 + $0x70] sm:$0xff]   ;;  %v1206_v11 = vld [vmem:[%s1610_s4 + $0x68] sm:$0xff]   ;;  %v42_v61 = vand.u32 127, %v41_v60 }
   0x3   :  { %v1200_v5 = vld [vmem:[%s1610_s4 + $0x38] sm:$0xff]   ;;  %1098 = vmatprep.subr.bf16.mxu1 %v1199_v4  ;;  %v1203_v8 = vld [vmem:[%s1610_s4 + $0xf0] sm:$0xff]   ;;  %v1207_v12 = vld [vmem:[%s1610_s4 + $0xe8] sm:$0xff]  }
   0x4   :  { %v1201_v6 = vld [vmem:[%s1610_s4 + $0xb8] sm:$0xff]   ;;  %1077 = vmatpush3.bf16.msra.mxu0 %v1200_v5  ;;  %v1204_v9 = vld [vmem:[%s1610_s4 + $0x30] sm:$0xff]   ;;  %v1208_v13 = vld [vmem:[%s1610_s4 + $0x28] sm:$0xff]  }
   0x5   :  { %1099 = vmatpush3.bf16.msra.mxu1 %v1201_v6  ;;  %1078 = vmatprep.subr.bf16.mxu0 %v1202_v7  ;;  %v1205_v10 = vld [vmem:[%s1610_s4 + $0xb0] sm:$0xff]   ;;  %v1209_v14 = vld [vmem:[%s1610_s4 + $0xa8] sm:$0xff]   ;;  %v1210_v15 = vld [vmem:[%s1610_s4 + $0x60] sm:$0xff]  }
   0x6   :  { %47 = vperm.xlu0 %1197, %v40_v2   ;;  %1100 = vmatprep.subr.bf16.mxu1 %v1203_v8  ;;  %v1211_v16 = vld [vmem:[%s1610_s4 + $0xe0] sm:$0xff]   ;;  %v1214_v19 = vld [vmem:[%s1610_s4 + $0x58] sm:$0xff]   ;;  %v1218_v23 = vld [vmem:[%s1610_s4 + $0x50] sm:$0xff]  }
   0x7   :  { %v1212_v17 = vld [vmem:[%s1610_s4 + $0x20] sm:$0xff]   ;;  %v1215_v20 = vld [vmem:[%s1610_s4 + $0xd8] sm:$0xff]   ;;  %v1219_v24 = vld [vmem:[%s1610_s4 + $0xd0] sm:$0xff]  }
   0x8   :  { %1079 = vmatpush3.bf16.msra.mxu0 %v1204_v9  ;;  %v1213_v18 = vld [vmem:[%s1610_s4 + $0xa0] sm:$0xff]   ;;  %v1216_v21 = vld [vmem:[%s1610_s4 + $0x18] sm:$0xff]   ;;  %v1220_v25 = vld [vmem:[%s1610_s4 + $0x10] sm:$0xff]  }
   0x9   :  { %1101 = vmatpush3.bf16.msra.mxu1 %v1205_v10  ;;  %1080 = vmatprep.subr.bf16.mxu0 %v1206_v11  ;;  %v1217_v22 = vld [vmem:[%s1610_s4 + $0x98] sm:$0xff]   ;;  %v1221_v26 = vld [vmem:[%s1610_s4 + $0x90] sm:$0xff]   ;;  %v1222_v27 = vld [vmem:[%s1610_s4 + $0x48] sm:$0xff]  }
   0xa   :  { %1102 = vmatprep.subr.bf16.mxu1 %v1207_v12  ;;  %v1223_v28 = vld [vmem:[%s1610_s4 + $0xc8] sm:$0xff]   ;;  %v1226_v31 = vld [vmem:[%s1610_s4 + $0x40] sm:$0xff]   ;;  %v1237_v41 = vld [vmem:[%s1613_s5 + $0x78] sm:$0xff]  }
   0xb   :  { %v1224_v29 = vld [vmem:[%s1610_s4 + $0x8] sm:$0xff]   ;;  %v1227_v32 = vld [vmem:[%s1610_s4 + $0xc0] sm:$0xff]   ;;  %v1238_v42 = vld [vmem:[%s1613_s5 + $0x38] sm:$0xff]  }
   0xc   :  { %1081 = vmatpush3.bf16.msra.mxu0 %v1208_v13  ;;  %v1225_v30 = vld [vmem:[%s1610_s4 + $0x88] sm:$0xff]   ;;  %v1228_v33 = vld [vmem:[%s1610_s4] sm:$0xff]   ;;  %v1239_v43 = vld [vmem:[%s1613_s5 + $0x70] sm:$0xff]  }
   0xd   :  { %1103 = vmatpush3.bf16.msra.mxu1 %v1209_v14  ;;  %1082 = vmatprep.subr.bf16.mxu0 %v1210_v15  ;;  %v1229_v34 = vld [vmem:[%s1610_s4 + $0x80] sm:$0xff]   ;;  %v1233_v37 = vld [vmem:[%s1611_s1 + $0x8] ss:$16 sps:$4 sm:$0xff]   ;;  %v1235_v39 = vld [vmem:[%s1611_s1 + $0xc] ss:$16 sps:$4 sm:$0xff]  }
   0xe   :  { %1104 = vmatprep.subr.bf16.mxu1 %v1211_v16  ;;  %v1230_v35 = vld [vmem:[%s1611_s1] ss:$16 sps:$4 sm:$0xff]   ;;  %v1232_v36 = vld [vmem:[%s1611_s1 + $0x4] ss:$16 sps:$4 sm:$0xff]   ;;  %411 = vmatprep.mubr.bf16.mxu1 %v1235_v39  ;;  %v1241_v45 = vld [vmem:[%s1613_s5 + $0xf8] sm:$0xff]  }
   0xf   :  { %370 = vmatprep.mubr.bf16.mxu0 %v1232_v36  ;;  %v1236_v40 = vld [vmem:[%s1612_s3] sm:$0xff]   ;;  %v1240_v44 = vld [vmem:[%s1613_s5 + $0x30] sm:$0xff]   ;;  %v1243_v46 = vld [vmem:[%s1613_s5 + $0x68] sm:$0xff]  }
  0x10   :  { %1083 = vmatpush3.bf16.msra.mxu0 %v1212_v17  ;;  %v1244_v47 = vld [vmem:[%s1613_s5 + $0x28] sm:$0xff]   ;;  %v1247_v48 = vld [vmem:[%s1613_s5 + $0x60] sm:$0xff]   ;;  %v1251_v50 = vld [vmem:[%s1613_s5 + $0x58] sm:$0xff]  }
  0x11   :  { %1105 = vmatpush3.bf16.msra.mxu1 %v1213_v18  ;;  %1084 = vmatprep.subr.bf16.mxu0 %v1214_v19  ;;  %v1248_v49 = vld [vmem:[%s1613_s5 + $0x20] sm:$0xff]   ;;  %v1252_v51 = vld [vmem:[%s1613_s5 + $0x18] sm:$0xff]   ;;  %v1255_v52 = vld [vmem:[%s1613_s5 + $0x50] sm:$0xff]  }
  0x12   :  { %1106 = vmatprep.subr.bf16.mxu1 %v1215_v20  ;;  %v1256_v53 = vld [vmem:[%s1613_s5 + $0x10] sm:$0xff]   ;;  %v1259_v54 = vld [vmem:[%s1613_s5 + $0x48] sm:$0xff]   ;;  %v1263_v56 = vld [vmem:[%s1613_s5 + $0x40] sm:$0xff]  }
  0x13   :  { %v1260_v55 = vld [vmem:[%s1613_s5 + $0x8] sm:$0xff]   ;;  %v1264_v57 = vld [vmem:[%s1613_s5] sm:$0xff]   ;;  %v1242_v2 = vld [vmem:[%s1613_s5 + $0xb8] sm:$0xff]  }
  0x14   :  { %1085 = vmatpush3.bf16.msra.mxu0 %v1216_v21  ;;  %v1268_v58 = vld [vmem:[%s1614_s2 + $0x4] ss:$16 sps:$4 sm:$0xff]   ;;  %v1266_v59 = vld [vmem:[%s1614_s2] ss:$16 sps:$4 sm:$0xff]   ;;  %v1274_v3 = vld [vmem:[%s1614_s2 + $0xc] ss:$16 sps:$4 sm:$0xff]  }
  0x15   :  { %1107 = vmatpush3.bf16.msra.mxu1 %v1217_v22  ;;  %1086 = vmatprep.subr.bf16.mxu0 %v1218_v23  ;;  %v1245_v5 = vld [vmem:[%s1613_s5 + $0xf0] sm:$0xff]   ;;  %v1249_v7 = vld [vmem:[%s1613_s5 + $0xe8] sm:$0xff]   ;;  %v1253_v9 = vld [vmem:[%s1613_s5 + $0xe0] sm:$0xff]  }
  0x16   :  { %1108 = vmatprep.subr.bf16.mxu1 %v1219_v24  ;;  %v1246_v6 = vld [vmem:[%s1613_s5 + $0xb0] sm:$0xff]   ;;  %v1250_v8 = vld [vmem:[%s1613_s5 + $0xa8] sm:$0xff]   ;;  %v1254_v10 = vld [vmem:[%s1613_s5 + $0xa0] sm:$0xff]  }
  0x17   :  { %v1257_v11 = vld [vmem:[%s1613_s5 + $0xd8] sm:$0xff]   ;;  %v1261_v13 = vld [vmem:[%s1613_s5 + $0xd0] sm:$0xff]   ;;  %v1265_v15 = vld [vmem:[%s1613_s5 + $0xc8] sm:$0xff]  }
  0x18   :  { %1087 = vmatpush3.bf16.msra.mxu0 %v1220_v25  ;;  %v1258_v12 = vld [vmem:[%s1613_s5 + $0x98] sm:$0xff]   ;;  %v1262_v14 = vld [vmem:[%s1613_s5 + $0x90] sm:$0xff]   ;;  %v1269_v16 = vld [vmem:[%s1613_s5 + $0x88] sm:$0xff]  }
  0x19   :  { %1109 = vmatpush3.bf16.msra.mxu1 %v1221_v26  ;;  %1088 = vmatprep.subr.bf16.mxu0 %v1222_v27  ;;  %v1270_v17 = vld [vmem:[%s1613_s5 + $0xc0] sm:$0xff]   ;;  %v1272_v19 = vld [vmem:[%s1614_s2 + $0x8] ss:$16 sps:$4 sm:$0xff]  }
  0x1a   :  { %1110 = vmatprep.subr.bf16.mxu1 %v1223_v28  ;;  %v1271_v18 = vld [vmem:[%s1613_s5 + $0x80] sm:$0xff]   ;;  %v1275_v20 = vld [vmem:[%s1615_s7 + $0x8] sm:$0xff]  }
  0x1b   :  { %v1276_v21 = vld [vmem:[%s1615_s7] sm:$0xff]  }
  0x1c   :  { %1089 = vmatpush3.bf16.msra.mxu0 %v1224_v29 }
  0x1d   :  { %1111 = vmatpush3.bf16.msra.mxu1 %v1225_v30  ;;  %1090 = vmatprep.subr.bf16.mxu0 %v1226_v31 }
  0x1e   :  { %1112 = vmatprep.subr.bf16.mxu1 %v1227_v32 }
  0x20   :  { %1091 = vmatpush3.bf16.msra.mxu0 %v1228_v33 }
  0x21   :  { %1113 = vmatpush3.bf16.msra.mxu1 %v1229_v34  ;;  %1172 = vmatprep.subr.bf16.mxu0 %v1280_v38 }
  0x22   :  { %1122 = vmatprep.subr.bf16.mxu1 %v1237_v41 }
  0x23   :  { %371 = vmatmul.mubr.bf16.vlgmr.msra.gmra.mxu0 %v1230_v35 }
  0x24   :  { %1174 = vmatprep.mubr.msk.bf16.mxu0 %vm1281_vm0, %v1280_v38  ;;  %412 = vmatmul.mubr.bf16.vlgmr.msra.gmra.mxu1 %v1233_v37 }
  0x25   :  { %1173 = vmatpush3.bf16.msra.mxu0 %v1236_v40  ;;  %1123 = vmatpush3.bf16.msra.mxu1 %v1238_v42 }
  0x26   :  { %1124 = vmatprep.subr.bf16.mxu1 %v1239_v43  ;;  %1144 = vmatprep.subr.bf16.mxu0 %v1241_v45 }
  0x27   :  { %783 = vmatprep.mubr.bf16.mxu1 %v1268_v58 }
  0x29   :  { %1125 = vmatpush3.bf16.msra.mxu1 %v1240_v44 }
  0x2a   :  { %1126 = vmatprep.subr.bf16.mxu1 %v1243_v46 }
  0x2d   :  { %1127 = vmatpush3.bf16.msra.mxu1 %v1244_v47 }
  0x2e   :  { %1128 = vmatprep.subr.bf16.mxu1 %v1247_v48 }
  0x31   :  { %1129 = vmatpush3.bf16.msra.mxu1 %v1248_v49 }
  0x32   :  { %1130 = vmatprep.subr.bf16.mxu1 %v1251_v50 }
  0x35   :  { %1131 = vmatpush3.bf16.msra.mxu1 %v1252_v51 }
  0x36   :  { %1132 = vmatprep.subr.bf16.mxu1 %v1255_v52 }
  0x39   :  { %1133 = vmatpush3.bf16.msra.mxu1 %v1256_v53 }
  0x3a   :  { %1134 = vmatprep.subr.bf16.mxu1 %v1259_v54 }
  0x3d   :  { %1135 = vmatpush3.bf16.msra.mxu1 %v1260_v55 }
  0x3e   :  { %1136 = vmatprep.subr.bf16.mxu1 %v1263_v56  ;;  %v1067_v56 = vld [vmem:[%s1616_s6] ss:$0 sm:$0xff] }
  0x41   :  { %1137 = vmatpush3.bf16.msra.mxu1 %v1264_v57 }
  0x42   :  { %1178 = vmatprep.subr.bf16.mxu1 %v1280_v38 }
  0x44   :  { %784 = vmatmul.mubr.bf16.vlgmr.msra.gmra.mxu1 %v1266_v59 }
  0x45   :  { %1182 = vmatprep.mubr.msk.bf16.mxu1 %vm1281_vm0, %v1280_v38  ;;  %1179 = vmatpush3.bf16.msra.mxu1 %v1275_v20 }
  0x46   :  { %1180 = vmatprep.subr.bf16.mxu1 %v1280_v38 }
  0x49   :  { %1181 = vmatpush3.bf16.msra.mxu1 %v1276_v21 }
  0x7d   :  { %v45_v62 = vpop.permute.xlu0 %44 }
  0x7e   :  { %vm49_vm1 = vcmp.eq.s32.totalorder %v45_v62, %v42_v61 }
  0x7f   :  { %v991_v0 = vsel %vm49_vm1, 1.0, %v1280_v38 }
  0x81   :  { %v48_v63 = vpop.permute.xlu0 %47 }
  0x82   :  { %vm50_vm2 = vcmp.eq.s32.totalorder %v48_v63, %v42_v61 }
  0x83   :  { %v992_v1 = vsel %vm50_vm2, 1.0, %v1280_v38 }
  0x84   :  { %v55_v4 = vpack.c.bf16 %v992_v1, %v991_v0  ;;  %v1277_v1 = vld [vmem:[%s1617_s9 + $0x8] sm:$0xff]  }
  0x86   :  { %1175 = vmatmul.mubr.msk.bf16.vlgmr.msra.gmra.mxu0 %vm426_vm3, %v55_v4 }
  0x87   :  { %1145 = vmatpush3.bf16.msra.mxu0 %v1242_v2  ;;  %824 = vmatprep.mubr.bf16.mxu0 %v1274_v3  ;;  %v1278_v2 = vld [vmem:[%s1617_s9] sm:$0xff]  }
  0x88   :  { %1146 = vmatprep.subr.bf16.mxu0 %v1245_v5  ;;  %v1068_v3 = vld [vmem:[%s1618_s8] ss:$0 sm:$0xff] }
  0x8b   :  { %1147 = vmatpush3.bf16.msra.mxu0 %v1246_v6 }
  0x8c   :  { %1148 = vmatprep.subr.bf16.mxu0 %v1249_v7 }
  0x8f   :  { %1149 = vmatpush3.bf16.msra.mxu0 %v1250_v8 }
  0x90   :  { %1150 = vmatprep.subr.bf16.mxu0 %v1253_v9 }
  0x93   :  { %1151 = vmatpush3.bf16.msra.mxu0 %v1254_v10 }
  0x94   :  { %1152 = vmatprep.subr.bf16.mxu0 %v1257_v11 }
  0x97   :  { %1153 = vmatpush3.bf16.msra.mxu0 %v1258_v12 }
  0x98   :  { %1154 = vmatprep.subr.bf16.mxu0 %v1261_v13 }
  0x9b   :  { %1155 = vmatpush3.bf16.msra.mxu0 %v1262_v14 }
  0x9c   :  { %1156 = vmatprep.subr.bf16.mxu0 %v1265_v15 }
  0x9f   :  { %1157 = vmatpush3.bf16.msra.mxu0 %v1269_v16 }
  0xa0   :  { %1158 = vmatprep.subr.bf16.mxu0 %v1270_v17 }
  0xa3   :  { %1159 = vmatpush3.bf16.msra.mxu0 %v1271_v18 }
  0xa4   :  { %1186 = vmatprep.subr.bf16.mxu0 %v1280_v38 }
  0xa6   :  { %825 = vmatmul.mubr.bf16.vlgmr.msra.gmra.mxu0 %v1272_v19 }
  0xa7   :  { %1190 = vmatprep.mubr.msk.bf16.mxu0 %vm1281_vm0, %v1280_v38  ;;  %1187 = vmatpush3.bf16.msra.mxu0 %v1277_v1 }
  0xa8   :  { %1188 = vmatprep.subr.bf16.mxu0 %v1280_v38  ;;  %v1072_v38 = vld [vmem:[%s1619_s10] ss:$0 sm:$0xff] }
  0xab   :  { %1189 = vmatpush3.bf16.msra.mxu0 %v1278_v2 }
  0xe3   :  { %v1092_v22 = vpop.f32.mrf.mxu0 }
  0xe4   :  { %v1114_v30 = vpop.f32.mrf.mxu1 }
  0xe5   :  { %v1093_v23 = vpop.f32.mrf.mxu0 }
  0xe6   :  { %v1115_v31 = vpop.f32.mrf.mxu1  ;;  %v1094_v36 = vadd.f32 %v1093_v23, %v1092_v22 }
  0xe7   :  { %v1095_v24 = vpop.f32.mrf.mxu0  ;;  %v1116_v37 = vadd.f32 %v1115_v31, %v1114_v30 }
  0xe8   :  { %v1117_v32 = vpop.f32.mrf.mxu1 }
  0xe9   :  { %v1096_v25 = vpop.f32.mrf.mxu0  ;;  %v414_v44 = vadd.f32 %v1116_v37, %v1094_v36 }
  0xea   :  { %v1118_v33 = vpop.f32.mrf.mxu1  ;;  %v1097_v41 = vadd.f32 %v1096_v25, %v1095_v24 }
  0xeb   :  { %v1119_v43 = vadd.f32 %v1118_v33, %v1117_v32 }
  0xed   :  { %v417_v52 = vadd.f32 %v1119_v43, %v1097_v41 }
 0x104   :  { %v1138_v34 = vpop.f32.mrf.mxu1 }
 0x106   :  { %v1139_v35 = vpop.f32.mrf.mxu1 }
 0x107   :  { %v1140_v45 = vadd.f32 %v1139_v35, %v1138_v34 }
 0x108   :  { %v1141_v39 = vpop.f32.mrf.mxu1 }
 0x10a   :  { %v1142_v47 = vpop.f32.mrf.mxu1 }
 0x10b   :  { %v1143_v53 = vadd.f32 %v1142_v47, %v1141_v39 }
 0x146   :  { %v464_v26 = vpop.f32.mrf.mxu0 }
 0x147   :  { %v465_v49 = vadd.f32 %v464_v26, %v414_v44 }
 0x148   :  { %v1176_v27 = vpop.f32.mrf.mxu0 }
 0x14a   :  { %v467_v28 = vpop.f32.mrf.mxu0 }
 0x14b   :  { %v468_v57 = vadd.f32 %v467_v28, %v417_v52 }
 0x14c   :  { %v1177_v29 = vpop.f32.mrf.mxu0 }
 0x166   :  { %v1160_v40 = vpop.f32.mrf.mxu0 }
 0x168   :  { %v1161_v42 = vpop.f32.mrf.mxu0 }
 0x169   :  { %v1162_v46 = vadd.f32 %v1161_v42, %v1160_v40 }
 0x16a   :  { %v1163_v48 = vpop.f32.mrf.mxu0 }
 0x16b   :  { %v827_v50 = vadd.f32 %v1162_v46, %v1140_v45 }
 0x16c   :  { %v1164_v51 = vpop.f32.mrf.mxu0 }
 0x16d   :  { %v833_v54 = vadd.f32 %v827_v50, %v465_v49  ;;  %v1165_v55 = vadd.f32 %v1164_v51, %v1163_v48 }
 0x16f   :  { %v830_v58 = vadd.f32 %v1165_v55, %v1143_v53  ;;  %v842_v59 = vadd.f32 %v1067_v56, %v833_v54 }
 0x171   :  { %v834_v60 = vadd.f32 %v830_v58, %v468_v57  ;;  %v844_v62 = vmax.f32 %v842_v59, 0.0 }
 0x173   :  { %v843_v61 = vadd.f32 %v1067_v56, %v834_v60 }
 0x175   :  { %v845_v63 = vmax.f32 %v843_v61, 0.0 }
 0x177   :  { %v846_v0 = vpack.c.bf16 %v845_v63, %v844_v62 }
 0x179   :  { %1183 = vmatmul.mubr.msk.bf16.vlgmr.msra.gmra.mxu1 %vm870_vm4, %v846_v0 }
 0x239   :  { %v908_v4 = vpop.f32.mrf.mxu1 }
 0x23a   :  { %v909_v6 = vadd.f32 %v1068_v3, %v908_v4 }
 0x23b   :  { %v1184_v5 = vpop.f32.mrf.mxu1 }
 0x23c   :  { %v915_v10 = vmax.f32 %v909_v6, 0.0 }
 0x23d   :  { %v911_v7 = vpop.f32.mrf.mxu1 }
 0x23e   :  { %v912_v8 = vadd.f32 %v1068_v3, %v911_v7 }
 0x23f   :  { %v1185_v9 = vpop.f32.mrf.mxu1 }
 0x240   :  { %v916_v11 = vmax.f32 %v912_v8, 0.0 }
 0x242   :  { %v917_v12 = vpack.c.bf16 %v916_v11, %v915_v10 }
 0x244   :  { %1191 = vmatmul.mubr.msk.bf16.vlgmr.msra.gmra.mxu0 %vm870_vm4, %v917_v12 }
 0x304   :  { %v978_v13 = vpop.f32.mrf.mxu0 }
 0x305   :  { %v979_v14 = vadd.f32 %v1072_v38, %v978_v13 }
 0x306   :  { %v1192_v15 = vpop.f32.mrf.mxu0 }
 0x307   :  { %985 = vst [vmem:[%s1620_s11] sm:$0xff] %v979_v14 }
 0x308   :  { %v981_v16 = vpop.f32.mrf.mxu0 }
 0x309   :  { %v982_v17 = vadd.f32 %v1072_v38, %v981_v16 }
 0x30a   :  { %v1193_v18 = vpop.f32.mrf.mxu0 }
 0x30b   :  { %986 = vst [vmem:[%s1620_s11 + $0x8] sm:$0xff] %v982_v17 }

</bundles_post_ra>
